<compile_context>
chip_gen: v7x
topology: tpu7x:2x2x1
jax: 0.10.0
libtpu: 0.0.40
codegen_flags: <defaults>
</compile_context>

<pallas_src>
import functools

import jax
import jax.numpy as jnp
from jax import lax
from jax.experimental import pallas as pl
from jax.experimental.pallas import tpu as pltpu


_LANE_TILE_MAX = 1024   # max lanes per grid step (multiple of 128)
_NEG_SLOPE = 0.2        # LeakyReLU slope used by the module
_BN_EPS = 1e-5          # torch BatchNorm2d default


def _round_up(v, m):
    return (v + m - 1) // m * m


def _lane_tiling(n):
    """Pick (lane_tile, padded_n): tile is a multiple of 128, prefers >= 2 grid
    steps (dual-TensorCore chips) while capping the per-step block size."""
    n128 = _round_up(n, 128)
    if n128 <= 128:
        tn = 128
    elif n128 <= 2 * _LANE_TILE_MAX:
        tn = _round_up(max(n128 // 2, 128), 128)
    else:
        tn = _LANE_TILE_MAX
    return tn, _round_up(n, tn)


# ---------------------------------------------------------------------------
# Pallas kernel: out = act(W @ X + b) on a lane-dense (C_out, TN) tile.
# ---------------------------------------------------------------------------
def _mm_bias_act_kernel(x_ref, w_ref, b_ref, o_ref, *, negative_slope):
    x = x_ref[...].astype(jnp.float32)                       # (K, TN)
    w = w_ref[...].astype(jnp.float32)                       # (C_out, K)
    y = jnp.dot(w, x, preferred_element_type=jnp.float32)    # (C_out, TN) MXU
    y = y + b_ref[...].astype(jnp.float32)                   # (C_out, 1) -> lanes
    if negative_slope is not None:
        y = jnp.where(y >= 0.0, y, jnp.float32(negative_slope) * y)
    o_ref[...] = y.astype(o_ref.dtype)


def _matmul_bias_act(x_mat, w_eff, b_eff, negative_slope):
    """x_mat: (K, N) activations, w_eff: (C_out, K), b_eff: (C_out,)."""
    k_dim, n = x_mat.shape
    c_out = w_eff.shape[0]
    tn, n_pad = _lane_tiling(n)
    if n_pad != n:  # keep the stored lane width 128-aligned (no masked stores)
        x_mat = jnp.pad(x_mat, ((0, 0), (0, n_pad - n)))

    kernel = functools.partial(_mm_bias_act_kernel,
                               negative_slope=negative_slope)
    out = pl.pallas_call(
        kernel,
        out_shape=jax.ShapeDtypeStruct((c_out, n_pad), x_mat.dtype),
        grid_spec=pltpu.PrefetchScalarGridSpec(
            num_scalar_prefetch=0,
            grid=(n_pad // tn,),
            in_specs=[
                pl.BlockSpec((k_dim, tn), lambda i: (0, i)),     # activations
                pl.BlockSpec((c_out, k_dim), lambda i: (0, 0)),  # folded weight
                pl.BlockSpec((c_out, 1), lambda i: (0, 0)),      # folded bias
            ],
            out_specs=pl.BlockSpec((c_out, tn), lambda i: (0, i)),
        ),
        compiler_params=pltpu.CompilerParams(
            dimension_semantics=("parallel",),
            vmem_limit_bytes=32 * 1024 * 1024,
        ),
    )(x_mat, w_eff, b_eff.reshape(c_out, 1))

    if n_pad != n:
        out = out[:, :n]
    return out


# ---------------------------------------------------------------------------
# Wrapper-side layout / parameter plumbing (plain jnp, no compute hot loop).
# ---------------------------------------------------------------------------
def _im2col_3x3(a, spatial, dilation):
    """a: (C, B*H*W) -> (9*C, B*H*W): the 9 dilated taps, zero padded."""
    c = a.shape[0]
    b, h, w = spatial
    d = dilation
    x = a.reshape(c, b, h, w)
    xp = jnp.pad(x, ((0, 0), (0, 0), (d, d), (d, d)))
    cols = [xp[:, :, kh * d:kh * d + h, kw * d:kw * d + w]
            for kh in range(3) for kw in range(3)]
    return jnp.concatenate(cols, axis=0).reshape(9 * c, b * h * w)


def _fold_conv_bn(w, b, bn):
    """Fold eval-mode BatchNorm into the conv weight / bias.

    w: (C_out, C_in, kh, kw) torch layout -> (C_out, kh*kw*C_in) matmul layout;
    column index = (kh*3 + kw)*C_in + c, matching _im2col_3x3 ordering."""
    c_out = w.shape[0]
    w_mat = jnp.transpose(w, (0, 2, 3, 1)).reshape(c_out, -1)
    if bn is not None:
        gamma, beta, mean, var, eps = bn
        s = gamma / jnp.sqrt(var + eps)
        w_mat = w_mat * s[:, None]
        b = b * s + (beta - mean * s)
    return w_mat, b


def dilated_convolutions_forward(x, params):
    """x: (B, C_in, H, W) float32 NCHW. Returns (B, out_channels, H, W)."""
    b, c_in, h, w = x.shape
    spatial = (b, h, w)
    # channels on sublanes, B*H*W on lanes, kept for the whole chain.
    a = jnp.transpose(x, (1, 0, 2, 3)).reshape(c_in, b * h * w)

    for layer in params["convs"]:
        w_eff, b_eff = _fold_conv_bn(layer["w"], layer["b"], layer["bn"])
        if layer["ksize"] == 1:
            xin = a
        else:
            xin = _im2col_3x3(a, spatial, layer["dilation"])
        a = _matmul_bias_act(xin, w_eff, b_eff, _NEG_SLOPE)

    w_bt, b_bt = params["bottleneck"]
    w_eff, b_eff = _fold_conv_bn(w_bt, b_bt, None)
    a = _matmul_bias_act(a, w_eff, b_eff, None)   # bottleneck: no activation

    c_out = a.shape[0]
    return jnp.transpose(a.reshape(c_out, b, h, w), (1, 0, 2, 3))


# ---------------------------------------------------------------------------
# Pure-JAX reference mirroring the PyTorch forward (eval-mode BatchNorm).
# ---------------------------------------------------------------------------
def _reference_forward(x, params):
    dn = ("NCHW", "OIHW", "NCHW")
    a = x
    for layer in params["convs"]:
        p = layer["pad"]
        a = lax.conv_general_dilated(
            a, layer["w"], window_strides=(1, 1),
            padding=[(p, p), (p, p)],
            rhs_dilation=(layer["dilation"], layer["dilation"]),
            dimension_numbers=dn, precision=lax.Precision.HIGHEST)
        a = a + layer["b"][None, :, None, None]
        gamma, beta, mean, var, eps = layer["bn"]
        scale = (gamma / jnp.sqrt(var + eps))[None, :, None, None]
        a = (a - mean[None, :, None, None]) * scale + beta[None, :, None, None]
        a = jnp.where(a >= 0.0, a, _NEG_SLOPE * a)
    w_bt, b_bt = params["bottleneck"]
    a = lax.conv_general_dilated(
        a, w_bt, window_strides=(1, 1), padding=[(0, 0), (0, 0)],
        dimension_numbers=dn, precision=lax.Precision.HIGHEST)
    return a + b_bt[None, :, None, None]


def init_params(key, in_channels, out_channels, n_channels, n_convolutions):
    dilations = [2 ** k for k in range(n_convolutions)]
    specs = [(in_channels, n_channels, 1, 1, 0)]                     # 1x1 stem
    specs += [(n_channels, n_channels, 3, d, d) for d in dilations]  # dilated
    specs += [(n_channels, n_channels, 3, 1, 1)]                     # final 3x3

    convs = []
    for cin, cout, k, d, p in specs:
        key, kw, kb, kg, kbt, km, kv = jax.random.split(key, 7)
        convs.append(dict(
            w=0.1 * jax.random.normal(kw, (cout, cin, k, k), jnp.float32),
            b=0.1 * jax.random.normal(kb, (cout,), jnp.float32),
            bn=(1.0 + 0.1 * jax.random.normal(kg, (cout,), jnp.float32),   # gamma
                0.1 * jax.random.normal(kbt, (cout,), jnp.float32),        # beta
                0.1 * jax.random.normal(km, (cout,), jnp.float32),         # mean
                1.0 + 0.1 * jnp.abs(jax.random.normal(kv, (cout,), jnp.float32)),  # var
                _BN_EPS),
            ksize=k, dilation=d, pad=p))

    key, kw, kb = jax.random.split(key, 3)
    bottleneck = (
        0.1 * jax.random.normal(kw, (out_channels, n_channels, 1, 1), jnp.float32),
        0.1 * jax.random.normal(kb, (out_channels,), jnp.float32))
    return dict(convs=convs, bottleneck=bottleneck)


if __name__ == "__main__":
    # Module config: in_channels=4, out_channels=4, n_channels=8, n_convolutions=2
    B, IN_CH, H, W = 2, 4, 16, 16
    OUT_CH, N_CH, N_CONV = 4, 8, 2

    key = jax.random.PRNGKey(0)
    k_params, k_x = jax.random.split(key)
    params = init_params(k_params, IN_CH, OUT_CH, N_CH, N_CONV)
    x = jax.random.normal(k_x, (B, IN_CH, H, W), dtype=jnp.float32)

    out = dilated_convolutions_forward(x, params)
    jax.block_until_ready(out)

    ref = _reference_forward(x, params)
    assert out.shape == (B, OUT_CH, H, W), out.shape
    max_err = float(jnp.max(jnp.abs(out - ref)))
    assert jnp.allclose(out, ref, atol=2e-3, rtol=2e-3), (
        f"mismatch vs reference (max abs err {max_err})")

    print("KERNEL_OK")
</pallas_src>

<mosaic_0001>
module attributes {stable_mosaic.version = 11 : i64} {
  func.func @_mm_bias_act_kernel(%arg0: i32, %arg1: memref<4x256xf32, #tpu.memory_space<vmem>>, %arg2: memref<8x4xf32, #tpu.memory_space<vmem>>, %arg3: memref<8x1xf32, #tpu.memory_space<vmem>>, %arg4: memref<8x256xf32, #tpu.memory_space<vmem>>) attributes {dimension_semantics = [#tpu.dimension_semantics<parallel>], iteration_bounds = array<i64: 2>, scalar_prefetch = 0 : i64, scratch_operands = 0 : i64, tpu.core_type = #tpu.core_type<tc>, window_params = [{transform_indices = @transform_0, window_bounds = array<i64: 4, 256>}, {pipeline_mode = #tpu.pipeline_mode<synchronous>, transform_indices = @transform_1, window_bounds = array<i64: 8, 4>}, {pipeline_mode = #tpu.pipeline_mode<synchronous>, transform_indices = @transform_2, window_bounds = array<i64: 8, 1>}, {transform_indices = @transform_3, window_bounds = array<i64: 8, 256>}]} {
    %c0 = arith.constant 0 : index
    %c0_0 = arith.constant 0 : index
    %0 = vector.load %arg1[%c0, %c0_0] : memref<4x256xf32, #tpu.memory_space<vmem>>, vector<4x256xf32>
    %c0_1 = arith.constant 0 : index
    %c0_2 = arith.constant 0 : index
    %1 = vector.load %arg2[%c0_1, %c0_2] : memref<8x4xf32, #tpu.memory_space<vmem>>, vector<8x4xf32>
    %cst = arith.constant dense<0.000000e+00> : vector<8x256xf32>
    %2 = tpu.matmul %1, %0, %cst {dimension_numbers = #tpu.dot_dimension_numbers<[1], [0], [0], [1], [0, 0, 1, 1], [], []>} : vector<8x4xf32>, vector<4x256xf32>, vector<8x256xf32> -> vector<8x256xf32>
    %c0_3 = arith.constant 0 : index
    %c0_4 = arith.constant 0 : index
    %3 = vector.load %arg3[%c0_3, %c0_4] : memref<8x1xf32, #tpu.memory_space<vmem>>, vector<8x1xf32>
    %4 = vector.broadcast %3 : vector<8x1xf32> to vector<8x256xf32>
    %5 = arith.addf %2, %4 : vector<8x256xf32>
    %cst_5 = arith.constant 0.000000e+00 : f32
    %6 = vector.broadcast %cst_5 : f32 to vector<8x256xf32>
    %7 = arith.cmpf oge, %5, %6 : vector<8x256xf32>
    %cst_6 = arith.constant 2.000000e-01 : f32
    %8 = vector.broadcast %cst_6 : f32 to vector<8x256xf32>
    %9 = arith.mulf %8, %5 : vector<8x256xf32>
    %10 = arith.select %7, %5, %9 : vector<8x256xi1>, vector<8x256xf32>
    %c0_7 = arith.constant 0 : index
    %c0_8 = arith.constant 0 : index
    %11 = vector.load %arg4[%c0_7, %c0_8] : memref<8x256xf32, #tpu.memory_space<vmem>>, vector<8x256xf32>
    tpu.vector_store %arg4[%c0_7, %c0_8], %10 {strides = array<i32>} : memref<8x256xf32, #tpu.memory_space<vmem>>, vector<8x256xf32>,
    return
  }
  func.func @transform_0(%arg0: i32) -> (i32, i32) {
    %c0_i32 = arith.constant 0 : i32
    %c0_i32_0 = arith.constant 0 : i32
    return %c0_i32, %arg0 : i32, i32
  }
  func.func @transform_1(%arg0: i32) -> (i32, i32) {
    %c0_i32 = arith.constant 0 : i32
    %c0_i32_0 = arith.constant 0 : i32
    %c0_i32_1 = arith.constant 0 : i32
    return %c0_i32, %c0_i32_0 : i32, i32
  }
  func.func @transform_2(%arg0: i32) -> (i32, i32) {
    %c0_i32 = arith.constant 0 : i32
    %c0_i32_0 = arith.constant 0 : i32
    %c0_i32_1 = arith.constant 0 : i32
    return %c0_i32, %c0_i32_0 : i32, i32
  }
  func.func @transform_3(%arg0: i32) -> (i32, i32) {
    %c0_i32 = arith.constant 0 : i32
    %c0_i32_0 = arith.constant 0 : i32
    return %c0_i32, %arg0 : i32, i32
  }
}

</mosaic_0001>

<bundles_post_ra>
// kernel: tpu_custom_call.1
= control target key start
LH: loop header
LB: loop body
LE: loop exit
PB: predicated region body
PF: predicated region fallthrough
CT: control target
= control target key end

     0   :  { %8 = vsyncpa [#allocation3], 0  ;;  %s595_s0 = inlined_call_operand.vmem [shape: f32[4,512], index: 0, kind: input, shape index: {}]   ;;  %s596_s1 = inlined_call_operand.vmem [shape: f32[8,4], index: 1, kind: input, shape index: {}]   ;;  %s597_s2 = inlined_call_operand.vmem [shape: f32[8,1], index: 2, kind: input, shape index: {}]   ;;  %s598_s3 = inlined_call_operand.hbm [shape: f32[8,512], index: 3, kind: output, shape index: {}]  }
   0x1   :  { %10 = vsyncpa [#allocation3 + $0x1], 0  ;;  %s490_s12 = smov 0   ;;  %s492_s13 = smov 0  }
   0x2   :  { %s494_s14 = smov 0   ;;  %s496_s15 = smov 0  }
   0x3 LB: > { %s511_s16 = sadd.s32 4294967295, %s465_s15   ;;  %s344_s17 = sadd.s32 4294967294, %s465_s15   ;;  %s465_s15 = sphi %s496_s15, %s604_s15   ;;  %s461_s14 = sphi %s494_s14, %s603_s14   ;;  %s457_s13 = sphi %s492_s13, %s602_s13   ;;  %s453_s12 = sphi %s490_s12, %s601_s12  }
   0x4   : > { %s515_s18 = sadd.s32 1, %s465_s15   ;;  %s91_s19 = sadd.s32 1, %s461_s14 }
   0x5   : > { %s88_s20 = ssub.s32 %s465_s15, %s515_s18  ;;  %p101_p0 = scmp.ne.s32.totalorder %s461_s14, %s457_s13 }
   0x6   : > { %p89_p1 = scmp.eq.s32.totalorder %s88_s20, 0  ;;  %p102_p2 = scmp.eq.s32.totalorder %s511_s16, 1 }
   0x7   : > { %p107_p3 = scmp.ne.s32.totalorder %s457_s13, %s453_s12  ;;  %p108_p4 = scmp.eq.s32.totalorder %s344_s17, 1 }
   0x8   : > { %s526_s21 = scalar_select %p89_p1, %s461_s14, %s91_s19  }
   0x9   : > { %p528_p5 = por %p102_p2, %p101_p0  ;;  %p532_p6 = por %p108_p4, %p107_p3 }
   0xa   : > { %p347_p7 = scmp.ge.s32.totalorder %s465_s15, 1  ;;  %p141_p8 = scmp.lt.s32.totalorder %s465_s15, 3 }
   0xc   : > { %p142_p9 = pnand %p347_p7, %p141_p8 }
   0xd   : > { %s349_s24 = sshll.u32 (!%p142_p9), %s511_s16, 1  ;;  %v467_v0 = vmov (!%p142_p9), 0.0   ;;  %v468_v1 = vmov (!%p142_p9), 0   ;;  %v174_v2 = vld [vmem:[%s597_s2] sm:$0xff] (!%p142_p9)  ;;  %vm186_vm0 = vcmask (!%p142_p9), 1043456   ;;  %vm182_vm1 = vcmask (!%p142_p9), 31744  }
   0xe   : > { %145 = sbr.rel (%p142_p9) target bundleno = 261 (0x105), region = 32  ;;  %p166_p10 = scmp.lt.s32.totalorder (!%p142_p9), %s349_s24, 3  ;;  %255 = vmatprep.mubr.f32.mxu0 (!%p142_p9), %v467_v0  ;;  %401 = vset.pattern.permute.xlu0 (!%p142_p9), %v468_v1  ;;  %v173_v5 = vld [vmem:[%s596_s1] sm:$0xff] (!%p142_p9) }
   0xf   : > { %177 = vperm.xlu0 (!%p142_p9), %401, %v174_v2   ;;  %s162_s6 = sand.u32 (!%p142_p9), 1, %s457_s13   ;;  %s359_s8 = sshll.u32 (!%p142_p9), %s511_s16, 8 }
  0x10   : > { %s348_s7 = sshll.u32 (!%p142_p9), %s162_s6, 4  ;;  %s553_s19 = scalar_lea.hbm (!%p142_p9), %s598_s3, %s359_s8 }
  0x11   : > { %s164_s9 = scalar_lea.vmem (!%p142_p9), [#allocation2], %s348_s7  ;;  %s271_s16 = scalar_lea.sflag (!%p142_p9), [#allocation3], %s162_s6 }
  0x12   : > { %s285_s10 = sshll.u32 (!%p142_p9), %s164_s9, 4  ;;  %s555_s10 = int_to_ptr.vmem [resolvable:$true] %s285_s10 }
  0x13   : > { %s403_s20 = scalar_lea.vmem (!%p142_p9), %s555_s10, 256 }
  0x14   : > { %p404_p11 = scmp.ne.s32.totalorder (!%p142_p9), %s555_s10, %s403_s20 }
  0x15   : > { %s606_s24 = smov (!%p166_p10, %s349_s24), 3 }
  0x16   : > { %s350_s27 = sshll.u32 %s606_s24, 2  ;;  %p405_p12 = pnand %p404_p11, %p528_p5 }
  0x17   : > { %s169_s30 = scalar_lea.vmem %s595_s0, %s350_s27  ;;  %s469_s24 = smov [#allocation2]  }
  0x18   : > { %v172_v3 = vld [vmem:[%s169_s30] sm:$0xff]  ;;  %p406_p13 = pneg %p405_p12  ;;  %s407_s25 = sshll.u32 %s469_s24, 4  ;;  %s408_s25 = int_to_ptr.vmem [resolvable:$false] %s407_s25 }
  0x19   : > { %v181_v4 = vcombine.high %v172_v3, %v172_v3  ;;  %s409_s26 = scalar_lea.vmem %s408_s25, 512  ;;  %p410_p0 = scmp.lt.s32.totalorder %s555_s10, %s408_s25 }
  0x1a   : > { %p411_p1 = scmp.lt.s32.totalorder %s409_s26, %s403_s20 }
  0x1b   : > { %351 = vmatprep.subr.msk.mxu0 %vm186_vm0, %v181_v4 }
  0x1c   : > { %352 = vmatpush1.msk.msra.mxu0 %vm186_vm0, %v172_v3  ;;  %p412_p2 = por %p411_p1, %p410_p0 }
  0x1d   : > { %353 = vmatmul.mubr.msk.f32.vlgmr.msra.gmra.mrb[0].mxu0 %vm182_vm1, %v173_v5 }
  0x1e   : > { %p413_p3 = pnand %p412_p2, %p406_p13 }
  0x8e   : > { %v178_v6 = vpop.permute.xlu0 %177 }
  0xf0   : > { %v257_v7 = vpop.f32.mrb[0].mxu0 }
  0xf1   : > { %v258_v8 = vadd.f32 %v257_v7, %v178_v6  ;;  %v259_v9 = vpop.f32.mrb[1].mxu0 }
  0xf2   : > { %v260_v10 = vadd.f32 %v259_v9, %v178_v6 }
  0xf3   : > { %vm262_vm2 = vcmp.ge.f32.partialorder %v258_v8, 0.0  ;;  %v264_v11 = vmul.f32 0.2, %v258_v8 }
  0xf4   : > { %vm263_vm3 = vcmp.ge.f32.partialorder %v260_v10, 0.0  ;;  %v265_v12 = vmul.f32 0.2, %v260_v10 }
  0xf5   : > { %v266_v13 = vsel %vm262_vm2, %v258_v8, %v264_v11 }
  0xf6   : > { %v267_v14 = vsel %vm263_vm3, %v260_v10, %v265_v12  ;;  %268 = vst [vmem:[%s164_s9] sm:$0xff] %v266_v13 }
  0xf7   : > { %269 = vst [vmem:[%s164_s9 + $0x8] sm:$0xff] %v267_v14 }
  0xf8   : > { %416 = shalt.err (!%p413_p3)
}
  0xf9   : > { %s417_s27 = scalar_lea.hbm %s553_s19, 256  ;;  %s421_s30 = scalar_lea.hbm %s598_s3, 512 }
  0xfa   : > { %p418_p4 = scmp.ne.s32.totalorder %s553_s19, %s417_s27  ;;  %p422_p9 = scmp.lt.u32.totalorder %s553_s19, %s598_s3 }
  0xfb   : > { %p423_p10 = scmp.lt.u32.totalorder %s421_s30, %s417_s27  ;;  %p425_p12 = scmp.lt.u32.totalorder %s417_s27, %s553_s19 }
  0xfc   : > { %p419_p7 = pnand %p418_p4, %p528_p5 }
  0xfd   : > { %p424_p11 = por %p423_p10, %p422_p9 }
  0xfe   : > { %p420_p8 = pneg %p419_p7 }
  0xff   : > { %p426_p13 = por %p425_p12, %p424_p11 }
 0x101   : > { %p427_p0 = pnand %p426_p13, %p420_p8 }
 0x103   : > { %430 = shalt.err (!%p427_p0)
}
 0x104   : > { %360 = dma.vmem_to_hbm [thread:$0]  (%p528_p5), %s555_s10, 256, %s553_s19, %s271_s16  }
 0x105 PF: > { %p366_p1 = scmp.ge.s32.totalorder %s465_s15, 2  ;;  %s297_s6 = sand.u32 1, %s453_s12  }
 0x106   : > { %s298_s7 = scalar_lea.sflag [#allocation3], %s297_s6 }
 0x107   : > { %p363_p2 = pnand %p366_p1, %p532_p6 }
 0x109   : > { %448 = dma.done.wait (!%p363_p2), %s298_s7, 256  }
 0x10a   : > { %450 = vsyncadd (!%p363_p2), %s298_s7, 4294967040  ;;  %p13_p3 = scmp.ge.s32.totalorder %s515_s18, 4   ;;  %s601_s12 = smov %s457_s13 }
 0x10b   : > { %s602_s13 = smov %s461_s14  ;;  %s603_s14 = smov %s526_s21 }
 0x10c   : > { %s604_s15 = smov %s515_s18  ;;  %15 = sbr.rel (!%p13_p3) target bundleno = 3 (0x3), region = 67 }
 0x113   :  { %303 = vsyncpa [#allocation3], 1 }
 0x114   :  { %305 = vsyncpa [#allocation3 + $0x1], 1 }

</bundles_post_ra>
